<compile_context>
chip_gen: v6e
topology: v6e:2x2x1
jax: 0.10.0
libtpu: 0.0.40
codegen_flags: <defaults>
</compile_context>

<pallas_src>
import math
import functools

import jax
import jax.numpy as jnp
from jax.experimental import pallas as pl
from jax.experimental.pallas import tpu as pltpu

LANE = 128


def _round_up(n, m):
    return ((n + m - 1) // m) * m


def _pad2(x, rows, cols):
    r, c = x.shape
    return jnp.pad(x, ((0, rows - r), (0, cols - c)))


# ---------------------------------------------------------------------------
# Pallas kernel: full fused GCN forward (single grid point, everything in VMEM)
# ---------------------------------------------------------------------------
def _gcn_kernel(x_ref, a_ref, w1_ref, b1_ref, w2_ref, b2_ref, mask_ref, out_ref):
    # Matmul operands arrive in the compute dtype (bf16 by default); all
    # accumulation, bias adds, relu and the log-softmax run in f32.
    x = x_ref[...]                       # (NUp, NEp)
    a = a_ref[...]                       # (NUp, NUp)
    cdt = a.dtype

    # layer 1 (SparseFullyConnected, evaluated densely): X @ W1 + b1
    h1 = jnp.dot(x, w1_ref[...], preferred_element_type=jnp.float32) + b1_ref[...]
    # propagation + relu: relu(A_hat @ h1)
    h1 = jnp.maximum(
        jnp.dot(a, h1.astype(cdt), preferred_element_type=jnp.float32), 0.0)

    # TODO(synk): dropout is stochastic/training-only; evaluated in eval mode (identity).

    # layer 2 (DenseFullyConnected): h1 @ W2 + b2, then propagation A_hat @ h2
    h2 = jnp.dot(h1.astype(cdt), w2_ref[...],
                 preferred_element_type=jnp.float32) + b2_ref[...]
    z = jnp.dot(a, h2.astype(cdt), preferred_element_type=jnp.float32)

    # Precomputed additive mask row: 0 on valid label lanes, -1e30 on padded
    # lanes, so the log-softmax normalizer only sees the real logits.
    z = z + mask_ref[...]
    m = jnp.max(z, axis=1, keepdims=True)
    s = z - m
    lse = jnp.log(jnp.sum(jnp.exp(s), axis=1, keepdims=True))
    out_ref[...] = s - lse


# ---------------------------------------------------------------------------
# One-time parameter preparation: pad + cast the constant operands ONCE.
# ---------------------------------------------------------------------------
def prepare_gcn_params(a_hat, w1, b1, w2, b2, *, use_bf16=True):
    nu = a_hat.shape[0]
    ne, hidden = w1.shape
    nl = w2.shape[1]

    nu_p = _round_up(nu, LANE)
    ne_p = _round_up(ne, LANE)
    h_p = _round_up(hidden, LANE)
    nl_p = _round_up(nl, LANE)

    cdt = jnp.bfloat16 if use_bf16 else jnp.float32
    params = {
        "a_p": _pad2(a_hat, nu_p, nu_p).astype(cdt),
        "w1_p": _pad2(w1, ne_p, h_p).astype(cdt),
        "w2_p": _pad2(w2, h_p, nl_p).astype(cdt),
        "b1_p": _pad2(jnp.reshape(b1, (1, -1)), 1, h_p).astype(jnp.float32),
        "b2_p": _pad2(jnp.reshape(b2, (1, -1)), 1, nl_p).astype(jnp.float32),
        # additive label mask: 0 on the nl valid lanes, -1e30 on padded lanes
        "mask_p": jnp.where(jnp.arange(nl_p) < nl, 0.0, -1e30
                            ).astype(jnp.float32).reshape(1, nl_p),
    }
    return params, nl


# ---------------------------------------------------------------------------
# Per-call forward: pad X -> pallas_call -> slice, all under one jax.jit.
# ---------------------------------------------------------------------------
@functools.partial(jax.jit, static_argnames=("nl",))
def _gcn_forward_padded(x, a_p, w1_p, b1_p, w2_p, b2_p, mask_p, *, nl):
    nu, ne = x.shape
    nu_p = a_p.shape[0]
    ne_p, h_p = w1_p.shape
    nl_p = w2_p.shape[1]
    cdt = a_p.dtype
    itemsize = jnp.dtype(cdt).itemsize

    x_p = _pad2(x, nu_p, ne_p).astype(cdt)

    # --- cost estimate (advisory for the XLA scheduler) ---
    flops = 2 * (nu_p * ne_p * h_p        # X @ W1
                 + nu_p * nu_p * h_p      # A_hat @ h1
                 + nu_p * h_p * nl_p      # h1 @ W2
                 + nu_p * nu_p * nl_p)    # A_hat @ h2
    transcendentals = nu_p * nl_p + nu_p  # exp + log in the log-softmax
    in_bytes = ((x_p.size + a_p.size + w1_p.size + w2_p.size) * itemsize
                + (b1_p.size + b2_p.size + mask_p.size) * 4)
    out_bytes = nu_p * nl_p * 4

    # --- scoped VMEM budget: resident inputs + output + f32/bf16 temporaries,
    # with 2x headroom (defaults are only 16 MiB v5e / 32 MiB v6e+v7x). ---
    interm_bytes = (nu_p * h_p * (4 + itemsize)      # h1 f32 + bf16 copy
                    + nu_p * nl_p * (4 + itemsize)   # h2 f32 + bf16 copy
                    + nu_p * nl_p * 4)               # z / softmax temps
    vmem_limit = int(min(max((in_bytes + out_bytes + interm_bytes) * 2 + (1 << 20),
                             8 << 20),
                         100 << 20))

    vmem_spec = pl.BlockSpec(memory_space=pltpu.MemorySpace.VMEM)
    out_p = pl.pallas_call(
        _gcn_kernel,
        out_shape=jax.ShapeDtypeStruct((nu_p, nl_p), jnp.float32),
        in_specs=[vmem_spec] * 7,
        out_specs=vmem_spec,
        compiler_params=pltpu.CompilerParams(vmem_limit_bytes=vmem_limit),
        cost_estimate=pl.CostEstimate(
            flops=flops,
            transcendentals=transcendentals,
            bytes_accessed=in_bytes + out_bytes),
    )(x_p, a_p, w1_p, b1_p, w2_p, b2_p, mask_p)

    # Slice the valid node-rows / label-columns back out (fused in the jit).
    return out_p[:nu, :nl]


def gcn_forward(x, params, nl):
    return _gcn_forward_padded(
        x, params["a_p"], params["w1_p"], params["b1_p"],
        params["w2_p"], params["b2_p"], params["mask_p"], nl=nl)


# ---------------------------------------------------------------------------
# Glue: deterministic parameter init + adjacency normalization (plain JAX)
# ---------------------------------------------------------------------------
def xavier_uniform(key, shape):
    fan_in, fan_out = shape
    bound = math.sqrt(6.0 / (fan_in + fan_out))
    return jax.random.uniform(key, shape, jnp.float32, -bound, bound)


def uniform_bias(key, size):
    stdv = 1.0 / math.sqrt(size)
    return jax.random.uniform(key, (1, size), jnp.float32, -stdv, stdv)


def normalize_adjacency(A):
    """A_hat = D^-1/2 (A + I) D^-1/2  with self loops."""
    nu = A.shape[0]
    A_tilde = A + jnp.eye(nu, dtype=jnp.float32)
    deg = A_tilde.sum(axis=0)
    d_inv_sqrt = 1.0 / jnp.sqrt(deg)
    return (A_tilde * d_inv_sqrt[None, :]) * d_inv_sqrt[:, None]


def gcn_reference(x, a_hat, w1, b1, w2, b2):
    """Pure-JAX f32 reference for correctness checking."""
    h1 = jnp.maximum(a_hat @ (x @ w1 + b1), 0.0)
    h2 = h1 @ w2 + b2
    z = a_hat @ h2
    return jax.nn.log_softmax(z, axis=1)


if __name__ == "__main__":
    # small synthetic problem sizes
    NU = 16      # number of nodes  (args.nu)
    NE = 32      # number of input features (args.ne / number_of_features)
    HIDDEN = 32  # args.hidden
    NL = 8       # number_of_labels

    key = jax.random.PRNGKey(0)
    k_adj, k_feat, k_w1, k_b1, k_w2, k_b2 = jax.random.split(key, 6)

    # deterministic synthetic undirected adjacency (no self loops)
    adj_rand = jax.random.uniform(k_adj, (NU, NU))
    A = (adj_rand + adj_rand.T > 1.2).astype(jnp.float32)
    A = A * (1.0 - jnp.eye(NU, dtype=jnp.float32))
    A_hat = normalize_adjacency(A)

    # sparse feature matrix, built densely (feature_indices / feature_values)
    feat_rand = jax.random.uniform(k_feat, (NU, NE))
    X = jnp.where(feat_rand > 0.7, feat_rand, 0.0).astype(jnp.float32)

    # layer parameters (Xavier-uniform weights, uniform(-1/sqrt(out)) biases)
    W1 = xavier_uniform(k_w1, (NE, HIDDEN))
    b1 = uniform_bias(k_b1, HIDDEN)
    W2 = xavier_uniform(k_w2, (HIDDEN, NL))
    b2 = uniform_bias(k_b2, NL)

    # one-time pad + cast of the constant operands
    params, nl = prepare_gcn_params(A_hat, W1, b1, W2, b2)
    params = jax.tree_util.tree_map(jax.block_until_ready, params)

    out = jax.block_until_ready(gcn_forward(X, params, nl))

    # sanity: shape, log-softmax rows exponentiate-sum to 1, and (loosely,
    # since MXU inputs are bf16) match the f32 reference
    assert out.shape == (NU, NL)
    row_sums = jnp.exp(out).sum(axis=1)
    assert bool(jnp.all(jnp.abs(row_sums - 1.0) < 1e-4))
    ref = gcn_reference(X, A_hat, W1, b1, W2, b2)
    assert bool(jnp.max(jnp.abs(out - ref)) < 5e-2)

    print("KERNEL_OK")
</pallas_src>

<mosaic_0001>
module attributes {stable_mosaic.version = 11 : i64} {
  func.func @_gcn_kernel(%arg0: memref<128x128xbf16, #tpu.memory_space<vmem>>, %arg1: memref<128x128xbf16, #tpu.memory_space<vmem>>, %arg2: memref<128x128xbf16, #tpu.memory_space<vmem>>, %arg3: memref<1x128xf32, #tpu.memory_space<vmem>>, %arg4: memref<128x128xbf16, #tpu.memory_space<vmem>>, %arg5: memref<1x128xf32, #tpu.memory_space<vmem>>, %arg6: memref<1x128xf32, #tpu.memory_space<vmem>>, %arg7: memref<128x128xf32, #tpu.memory_space<vmem>>) attributes {dimension_semantics = [], scalar_prefetch = 0 : i64, scratch_operands = 0 : i64, tpu.core_type = #tpu.core_type<tc>} {
    %c0 = arith.constant 0 : index
    %c0_0 = arith.constant 0 : index
    %0 = vector.load %arg0[%c0, %c0_0] : memref<128x128xbf16, #tpu.memory_space<vmem>>, vector<128x128xbf16>
    %c0_1 = arith.constant 0 : index
    %c0_2 = arith.constant 0 : index
    %1 = vector.load %arg1[%c0_1, %c0_2] : memref<128x128xbf16, #tpu.memory_space<vmem>>, vector<128x128xbf16>
    %c0_3 = arith.constant 0 : index
    %c0_4 = arith.constant 0 : index
    %2 = vector.load %arg2[%c0_3, %c0_4] : memref<128x128xbf16, #tpu.memory_space<vmem>>, vector<128x128xbf16>
    %cst = arith.constant dense<0.000000e+00> : vector<128x128xf32>
    %3 = tpu.matmul %0, %2, %cst {dimension_numbers = #tpu.dot_dimension_numbers<[1], [0], [0], [1], [0, 0, 1, 1], [], []>} : vector<128x128xbf16>, vector<128x128xbf16>, vector<128x128xf32> -> vector<128x128xf32>
    %c0_5 = arith.constant 0 : index
    %c0_6 = arith.constant 0 : index
    %4 = vector.load %arg3[%c0_5, %c0_6] : memref<1x128xf32, #tpu.memory_space<vmem>>, vector<1x128xf32>
    %5 = vector.broadcast %4 : vector<1x128xf32> to vector<128x128xf32>
    %6 = arith.addf %3, %5 : vector<128x128xf32>
    %7 = arith.truncf %6 : vector<128x128xf32> to vector<128x128xbf16>
    %cst_7 = arith.constant dense<0.000000e+00> : vector<128x128xf32>
    %8 = tpu.matmul %1, %7, %cst_7 {dimension_numbers = #tpu.dot_dimension_numbers<[1], [0], [0], [1], [0, 0, 1, 1], [], []>} : vector<128x128xbf16>, vector<128x128xbf16>, vector<128x128xf32> -> vector<128x128xf32>
    %cst_8 = arith.constant 0.000000e+00 : f32
    %9 = vector.broadcast %cst_8 : f32 to vector<128x128xf32>
    %10 = arith.maximumf %8, %9 : vector<128x128xf32>
    %11 = arith.truncf %10 : vector<128x128xf32> to vector<128x128xbf16>
    %c0_9 = arith.constant 0 : index
    %c0_10 = arith.constant 0 : index
    %12 = vector.load %arg4[%c0_9, %c0_10] : memref<128x128xbf16, #tpu.memory_space<vmem>>, vector<128x128xbf16>
    %cst_11 = arith.constant dense<0.000000e+00> : vector<128x128xf32>
    %13 = tpu.matmul %11, %12, %cst_11 {dimension_numbers = #tpu.dot_dimension_numbers<[1], [0], [0], [1], [0, 0, 1, 1], [], []>} : vector<128x128xbf16>, vector<128x128xbf16>, vector<128x128xf32> -> vector<128x128xf32>
    %c0_12 = arith.constant 0 : index
    %c0_13 = arith.constant 0 : index
    %14 = vector.load %arg5[%c0_12, %c0_13] : memref<1x128xf32, #tpu.memory_space<vmem>>, vector<1x128xf32>
    %15 = vector.broadcast %14 : vector<1x128xf32> to vector<128x128xf32>
    %16 = arith.addf %13, %15 : vector<128x128xf32>
    %17 = arith.truncf %16 : vector<128x128xf32> to vector<128x128xbf16>
    %cst_14 = arith.constant dense<0.000000e+00> : vector<128x128xf32>
    %18 = tpu.matmul %1, %17, %cst_14 {dimension_numbers = #tpu.dot_dimension_numbers<[1], [0], [0], [1], [0, 0, 1, 1], [], []>} : vector<128x128xbf16>, vector<128x128xbf16>, vector<128x128xf32> -> vector<128x128xf32>
    %c0_15 = arith.constant 0 : index
    %c0_16 = arith.constant 0 : index
    %19 = vector.load %arg6[%c0_15, %c0_16] : memref<1x128xf32, #tpu.memory_space<vmem>>, vector<1x128xf32>
    %20 = vector.broadcast %19 : vector<1x128xf32> to vector<128x128xf32>
    %21 = arith.addf %18, %20 : vector<128x128xf32>
    %cst_17 = arith.constant dense<0xFF800000> : vector<128xf32>
    %22 = vector.multi_reduction <maximumf>, %21, %cst_17 [1] : vector<128x128xf32> to vector<128xf32>
    %23 = vector.shape_cast %22 : vector<128xf32> to vector<128x1xf32>
    %24 = vector.broadcast %23 : vector<128x1xf32> to vector<128x128xf32>
    %25 = arith.subf %21, %24 : vector<128x128xf32>
    %26 = math.exp %25 : vector<128x128xf32>
    %cst_18 = arith.constant dense<0.000000e+00> : vector<128xf32>
    %27 = vector.multi_reduction <add>, %26, %cst_18 [1] : vector<128x128xf32> to vector<128xf32>
    %28 = vector.shape_cast %27 : vector<128xf32> to vector<128x1xf32>
    %29 = math.log %28 : vector<128x1xf32>
    %30 = vector.broadcast %29 : vector<128x1xf32> to vector<128x128xf32>
    %31 = arith.subf %25, %30 : vector<128x128xf32>
    %c0_19 = arith.constant 0 : index
    %c0_20 = arith.constant 0 : index
    %32 = vector.load %arg7[%c0_19, %c0_20] : memref<128x128xf32, #tpu.memory_space<vmem>>, vector<128x128xf32>
    tpu.vector_store %arg7[%c0_19, %c0_20], %31 {strides = array<i32>} : memref<128x128xf32, #tpu.memory_space<vmem>>, vector<128x128xf32>,
    return
  }
}

</mosaic_0001>

<bundles_post_ra>
// kernel: _gcn_forward_padded.1
= control target key start
LH: loop header
LB: loop body
LE: loop exit
PB: predicated region body
PF: predicated region fallthrough
CT: control target
= control target key end

     0   :  { %12 = vsyncpa [#allocation3], 0  ;;  %s1584_s0 = inlined_call_operand.vmem [shape: bf16[128,128], index: 0, kind: input, shape index: {}]   ;;  %s1585_s1 = inlined_call_operand.vmem [shape: bf16[128,128], index: 1, kind: input, shape index: {}]   ;;  %s1586_s2 = inlined_call_operand.hbm [shape: bf16[128,128], index: 2, kind: input, shape index: {}]   ;;  %s1587_s3 = inlined_call_operand.vmem [shape: f32[1,128], index: 3, kind: input, shape index: {}]   ;;  %s1588_s4 = inlined_call_operand.hbm [shape: bf16[128,128], index: 4, kind: input, shape index: {}]   ;;  %s1589_s5 = inlined_call_operand.vmem [shape: f32[1,128], index: 5, kind: input, shape index: {}]   ;;  %s1590_s6 = inlined_call_operand.vmem [shape: f32[1,128], index: 6, kind: input, shape index: {}]   ;;  %s1591_s7 = inlined_call_operand.vmem [shape: f32[128,128], index: 7, kind: output, shape index: {}]  }
   0x1   :  { %13 = vsyncpa [#allocation5], 0  ;;  %s1313_s24 = smov [#allocation2]  }
   0x2   :  { %s23_s25 = sshll.u32 %s1313_s24, 4  ;;  %s24_s25 = int_to_ptr.vmem [resolvable:$true] %s23_s25 }
   0x3   :  { %s1277_s26 = scalar_lea.vmem %s24_s25, 1024  ;;  %p1282_p1 = scmp.lt.s32.totalorder %s24_s25, %s24_s25 }
   0x4   :  { %p1278_p0 = scmp.ne.s32.totalorder %s24_s25, %s1277_s26  ;;  %p1283_p2 = scmp.lt.s32.totalorder %s1277_s26, %s1277_s26 }
   0x6   :  { %p1284_p3 = por %p1283_p2, %p1282_p1 }
   0x8   :  { %p1285_p4 = pnand %p1284_p3, %p1278_p0 }
   0xa   :  { %1288 = shalt.err (!%p1285_p4)
}
   0xb   :  { %s1314_s27 = smov 64   ;;  %s1315_s28 = smov 4  }
   0xc   :  { %29 = dma.hbm_to_vmem [thread:$0]  %s1586_s2, 1024, %s24_s25, [#allocation3], %s1314_s27, %s1314_s27, %s1315_s28  }
   0xd   :  { %s1316_s8 = smov [#allocation4]  }
   0xe   :  { %s37_s9 = sshll.u32 %s1316_s8, 4  ;;  %s38_s9 = int_to_ptr.vmem [resolvable:$true] %s37_s9 }
   0xf   :  { %s1297_s10 = scalar_lea.vmem %s38_s9, 1024  ;;  %p1302_p6 = scmp.lt.s32.totalorder %s38_s9, %s38_s9 }
  0x10   :  { %p1298_p5 = scmp.ne.s32.totalorder %s38_s9, %s1297_s10  ;;  %p1303_p7 = scmp.lt.s32.totalorder %s1297_s10, %s1297_s10 }
  0x12   :  { %p1304_p8 = por %p1303_p7, %p1302_p6 }
  0x14   :  { %p1305_p9 = pnand %p1304_p8, %p1298_p5 }
  0x16   :  { %1308 = shalt.err (!%p1305_p9)
}
  0x17   :  { %43 = dma.hbm_to_vmem [thread:$0]  %s1588_s4, 1024, %s38_s9, [#allocation5], %s1314_s27, %s1314_s27, %s1315_s28  }
  0x18   :  { %1309 = dma.done.wait [#allocation3], 1024  }
  0x19   :  { %1310 = vsyncadd [#allocation3], 4294966272 }
  0x1a   :  { %1311 = dma.done.wait [#allocation5], 1024  }
  0x1b   :  { %1312 = vsyncadd [#allocation5], 4294966272  ;;  %v1173_v0 = vld [vmem:[#allocation2 + $0x38] sm:$0xff]   ;;  %v1174_v1 = vld [vmem:[#allocation2 + $0x30] sm:$0xff]  }
  0x1c   :  { %1041 = vmatprep.subr.bf16.mxu0 %v1173_v0  ;;  %v1175_v2 = vld [vmem:[#allocation2 + $0x28] sm:$0xff]   ;;  %v1176_v3 = vld [vmem:[#allocation2 + $0x20] sm:$0xff]   ;;  %v1177_v5 = vld [vmem:[#allocation2 + $0x18] sm:$0xff]  }
  0x1d   :  { %1042 = vmatpush3.bf16.msra.mxu0 %v1173_v0  ;;  %v1181_v4 = vld [vmem:[%s1584_s0] sm:$0xff]   ;;  %v1178_v6 = vld [vmem:[#allocation2 + $0x10] sm:$0xff]   ;;  %v1179_v7 = vld [vmem:[#allocation2 + $0x8] sm:$0xff]  }
  0x1e   :  { %1043 = vmatprep.subr.bf16.mxu0 %v1174_v1  ;;  %1057 = vmatprep.mubr.bf16.mxu0 %v1181_v4  ;;  %v1180_v8 = vld [vmem:[#allocation2] sm:$0xff]   ;;  %v1182_v9 = vld [vmem:[%s1584_s0 + $0x8] sm:$0xff]   ;;  %v1183_v10 = vld [vmem:[%s1584_s0 + $0x10] sm:$0xff]  }
  0x1f   :  { %v1184_v11 = vld [vmem:[%s1584_s0 + $0x18] sm:$0xff]   ;;  %v1185_v12 = vld [vmem:[%s1584_s0 + $0x20] sm:$0xff]   ;;  %v1186_v13 = vld [vmem:[%s1584_s0 + $0x28] sm:$0xff]  }
  0x20   :  { %v1187_v14 = vld [vmem:[%s1584_s0 + $0x30] sm:$0xff]   ;;  %v1188_v15 = vld [vmem:[%s1584_s0 + $0x38] sm:$0xff]   ;;  %v1390_v16 = vld [vmem:[%s1585_s1] sm:$0xff]  }
  0x21   :  { %1044 = vmatpush3.bf16.msra.mxu0 %v1174_v1  ;;  %1089 = vmatprep.mubr.bf16.mxu1 %v1390_v16  ;;  %v1197_v17 = vld [vmem:[#allocation4 + $0x38] sm:$0xff]   ;;  %v1198_v18 = vld [vmem:[#allocation4 + $0x30] sm:$0xff]   ;;  %v1199_v19 = vld [vmem:[#allocation4 + $0x28] sm:$0xff]  }
  0x22   :  { %1045 = vmatprep.subr.bf16.mxu0 %v1175_v2  ;;  %v1200_v20 = vld [vmem:[#allocation4 + $0x20] sm:$0xff]   ;;  %v1201_v21 = vld [vmem:[#allocation4 + $0x18] sm:$0xff]   ;;  %v1399_v63 = vld [vmem:[%s1585_s1 + $0x8] sm:$0xff]  }
  0x23   :  { %v942_v36 = vld [vmem:[%s1587_s3] ss:$0 sm:$0xff]  ;;  %v1404_v0 = vld [vmem:[%s1585_s1 + $0x10] sm:$0xff]   ;;  %v1411_v1 = vld [vmem:[%s1585_s1 + $0x18] sm:$0xff]  }
  0x24   :  { %v1428_v4 = vld [vmem:[%s1585_s1 + $0x30] sm:$0xff]  }
  0x25   :  { %1046 = vmatpush3.bf16.msra.mxu0 %v1175_v2  ;;  %v1416_v2 = vld [vmem:[%s1585_s1 + $0x20] sm:$0xff]  }
  0x26   :  { %1047 = vmatprep.subr.bf16.mxu0 %v1176_v3 }
  0x29   :  { %1048 = vmatpush3.bf16.msra.mxu0 %v1176_v3  ;;  %v1423_v3 = vld [vmem:[%s1585_s1 + $0x28] sm:$0xff]  }
  0x2a   :  { %1049 = vmatprep.subr.bf16.mxu0 %v1177_v5 }
  0x2d   :  { %1050 = vmatpush3.bf16.msra.mxu0 %v1177_v5  ;;  %v1435_v5 = vld [vmem:[%s1585_s1 + $0x38] sm:$0xff]  }
  0x2e   :  { %1051 = vmatprep.subr.bf16.mxu0 %v1178_v6 }
  0x31   :  { %1052 = vmatpush3.bf16.msra.mxu0 %v1178_v6  ;;  %v1202_v6 = vld [vmem:[#allocation4 + $0x10] sm:$0xff]  }
  0x32   :  { %1053 = vmatprep.subr.bf16.mxu0 %v1179_v7 }
  0x35   :  { %1054 = vmatpush3.bf16.msra.mxu0 %v1179_v7  ;;  %v1203_v7 = vld [vmem:[#allocation4 + $0x8] sm:$0xff]  }
  0x36   :  { %1055 = vmatprep.subr.bf16.mxu0 %v1180_v8 }
  0x39   :  { %1056 = vmatpush3.bf16.msra.mxu0 %v1180_v8  ;;  %v1204_v8 = vld [vmem:[#allocation4] sm:$0xff]  }
  0x3a   :  { %1105 = vmatprep.subr.bf16.mxu0 %v1197_v17 }
  0x3c   :  { %1058 = vmatmul.mubr.bf16.vlgmr.msra.gmra.mxu0 %v1182_v9 }
  0x3d   :  { %1061 = vmatprep.mubr.bf16.mxu0 %v1183_v10  ;;  %1106 = vmatpush3.bf16.msra.mxu0 %v1197_v17 }
  0x3e   :  { %1107 = vmatprep.subr.bf16.mxu0 %v1198_v18 }
  0x41   :  { %1108 = vmatpush3.bf16.msra.mxu0 %v1198_v18 }
  0x42   :  { %1109 = vmatprep.subr.bf16.mxu0 %v1199_v19 }
  0x44   :  { %1062 = vmatmul.mubr.bf16.gmra.mxu0 %v1184_v11 }
  0x45   :  { %1065 = vmatprep.mubr.bf16.mxu0 %v1185_v12  ;;  %1110 = vmatpush3.bf16.msra.mxu0 %v1199_v19 }
  0x46   :  { %1111 = vmatprep.subr.bf16.mxu0 %v1200_v20 }
  0x49   :  { %1112 = vmatpush3.bf16.msra.mxu0 %v1200_v20 }
  0x4a   :  { %1113 = vmatprep.subr.bf16.mxu0 %v1201_v21 }
  0x4c   :  { %1066 = vmatmul.mubr.bf16.gmra.mxu0 %v1186_v13 }
  0x4d   :  { %1069 = vmatprep.mubr.bf16.mxu0 %v1187_v14  ;;  %1114 = vmatpush3.bf16.msra.mxu0 %v1201_v21 }
  0x4e   :  { %1115 = vmatprep.subr.bf16.mxu0 %v1202_v6 }
  0x51   :  { %1116 = vmatpush3.bf16.msra.mxu0 %v1202_v6  ;;  %v967_v6 = vld [vmem:[%s1589_s5] ss:$0 sm:$0xff] }
  0x52   :  { %1117 = vmatprep.subr.bf16.mxu0 %v1203_v7 }
  0x54   :  { %1070 = vmatmul.mubr.bf16.gmra.mxu0 %v1188_v15 }
  0x55   :  { %1118 = vmatpush3.bf16.msra.mxu0 %v1203_v7 }
  0x56   :  { %1119 = vmatprep.subr.bf16.mxu0 %v1204_v8 }
  0x59   :  { %1120 = vmatpush3.bf16.msra.mxu0 %v1204_v8 }
  0xfc   :  { %v1059_v22 = vpop.f32.mrf.mxu0 }
  0xfd   :  { %v249_v58 = vadd.f32 %v1059_v22, %v942_v36 }
  0xfe   :  { %v240_v23 = vpop.f32.mrf.mxu0 }
  0xff   :  { %v241_v61 = vadd.f32 %v942_v36, %v240_v23 }
 0x100   :  { %v1060_v24 = vpop.f32.mrf.mxu0 }
 0x101   :  { %v252_v56 = vadd.f32 %v1060_v24, %v942_v36 }
 0x102   :  { %v243_v25 = vpop.f32.mrf.mxu0 }
 0x103   :  { %v304_v59 = vpack.c.bf16 %v252_v56, %v249_v58  ;;  %v244_v60 = vadd.f32 %v942_v36, %v243_v25 }
 0x104   :  { %v1063_v26 = vpop.f32.mrf.mxu0 }
 0x105   :  { %v265_v52 = vadd.f32 %v1063_v26, %v942_v36  ;;  %v303_v62 = vpack.c.bf16 %v244_v60, %v241_v61 }
 0x106   :  { %v256_v27 = vpop.f32.mrf.mxu0 }
 0x107   :  { %v257_v55 = vadd.f32 %v942_v36, %v256_v27 }
 0x108   :  { %v1064_v28 = vpop.f32.mrf.mxu0 }
 0x109   :  { %v268_v50 = vadd.f32 %v1064_v28, %v942_v36 }
 0x10a   :  { %v259_v29 = vpop.f32.mrf.mxu0 }
 0x10b   :  { %v306_v53 = vpack.c.bf16 %v268_v50, %v265_v52  ;;  %v260_v54 = vadd.f32 %v942_v36, %v259_v29 }
 0x10c   :  { %v1067_v30 = vpop.f32.mrf.mxu0 }
 0x10d   :  { %v281_v46 = vadd.f32 %v1067_v30, %v942_v36  ;;  %v305_v57 = vpack.c.bf16 %v260_v54, %v257_v55 }
 0x10e   :  { %v272_v31 = vpop.f32.mrf.mxu0 }
 0x10f   :  { %v273_v49 = vadd.f32 %v942_v36, %v272_v31 }
 0x110   :  { %v1068_v32 = vpop.f32.mrf.mxu0 }
 0x111   :  { %v284_v44 = vadd.f32 %v1068_v32, %v942_v36 }
 0x112   :  { %v275_v33 = vpop.f32.mrf.mxu0 }
 0x113   :  { %v308_v47 = vpack.c.bf16 %v284_v44, %v281_v46  ;;  %v276_v48 = vadd.f32 %v942_v36, %v275_v33 }
 0x114   :  { %v1071_v34 = vpop.f32.mrf.mxu0 }
 0x115   :  { %v297_v38 = vadd.f32 %v1071_v34, %v942_v36  ;;  %v307_v51 = vpack.c.bf16 %v276_v48, %v273_v49 }
 0x116   :  { %v288_v35 = vpop.f32.mrf.mxu0 }
 0x117   :  { %v289_v41 = vadd.f32 %v942_v36, %v288_v35 }
 0x118   :  { %v1072_v37 = vpop.f32.mrf.mxu0 }
 0x119   :  { %v300_v39 = vadd.f32 %v1072_v37, %v942_v36 }
 0x11a   :  { %v291_v40 = vpop.f32.mrf.mxu0 }
 0x11b   :  { %v292_v42 = vadd.f32 %v942_v36, %v291_v40  ;;  %v310_v43 = vpack.c.bf16 %v300_v39, %v297_v38 }
 0x11d   :  { %v309_v45 = vpack.c.bf16 %v292_v42, %v289_v41  ;;  %1073 = vmatprep.subr.bf16.mxu1 %v310_v43 }
 0x11e   :  { %1074 = vmatpush3.bf16.msra.mxu1 %v310_v43 }
 0x11f   :  { %1075 = vmatprep.subr.bf16.mxu1 %v309_v45 }
 0x122   :  { %1076 = vmatpush3.bf16.msra.mxu1 %v309_v45 }
 0x123   :  { %1077 = vmatprep.subr.bf16.mxu1 %v308_v47 }
 0x126   :  { %1078 = vmatpush3.bf16.msra.mxu1 %v308_v47 }
 0x127   :  { %1079 = vmatprep.subr.bf16.mxu1 %v307_v51 }
 0x12a   :  { %1080 = vmatpush3.bf16.msra.mxu1 %v307_v51 }
 0x12b   :  { %1081 = vmatprep.subr.bf16.mxu1 %v306_v53 }
 0x12e   :  { %1082 = vmatpush3.bf16.msra.mxu1 %v306_v53 }
 0x12f   :  { %1083 = vmatprep.subr.bf16.mxu1 %v305_v57 }
 0x132   :  { %1084 = vmatpush3.bf16.msra.mxu1 %v305_v57 }
 0x133   :  { %1085 = vmatprep.subr.bf16.mxu1 %v304_v59 }
 0x136   :  { %1086 = vmatpush3.bf16.msra.mxu1 %v304_v59 }
 0x137   :  { %1087 = vmatprep.subr.bf16.mxu1 %v303_v62 }
 0x13a   :  { %1088 = vmatpush3.bf16.msra.mxu1 %v303_v62 }
 0x13d   :  { %1090 = vmatmul.mubr.bf16.vlgmr.msra.gmra.mxu1 %v1399_v63 }
 0x13e   :  { %1093 = vmatprep.mubr.bf16.mxu1 %v1404_v0 }
 0x145   :  { %1094 = vmatmul.mubr.bf16.gmra.mxu1 %v1411_v1 }
 0x146   :  { %1097 = vmatprep.mubr.bf16.mxu1 %v1416_v2 }
 0x14d   :  { %1098 = vmatmul.mubr.bf16.gmra.mxu1 %v1423_v3 }
 0x14e   :  { %1101 = vmatprep.mubr.bf16.mxu1 %v1428_v4 }
 0x155   :  { %1102 = vmatmul.mubr.bf16.gmra.mxu1 %v1435_v5 }
 0x156   :  { %1153 = vmatprep.mubr.bf16.mxu1 %v1390_v16 }
 0x1fd   :  { %v1091_v9 = vpop.f32.mrf.mxu1 }
 0x1fe   :  { %v458_v17 = vmax.f32 %v1091_v9, 0.0 }
 0x1ff   :  { %v393_v10 = vpop.f32.mrf.mxu1 }
 0x200   :  { %v456_v14 = vmax.f32 %v393_v10, 0.0 }
 0x201   :  { %v1092_v11 = vpop.f32.mrf.mxu1 }
 0x202   :  { %v459_v12 = vmax.f32 %v1092_v11, 0.0 }
 0x203   :  { %v396_v13 = vpop.f32.mrf.mxu1 }
 0x204   :  { %v457_v15 = vmax.f32 %v396_v13, 0.0  ;;  %v473_v16 = vpack.c.bf16 %v459_v12, %v458_v17 }
 0x205   :  { %v1095_v18 = vpop.f32.mrf.mxu1 }
 0x206   :  { %v472_v19 = vpack.c.bf16 %v457_v15, %v456_v14  ;;  %v462_v26 = vmax.f32 %v1095_v18, 0.0 }
 0x207   :  { %v409_v20 = vpop.f32.mrf.mxu1 }
 0x208   :  { %1121 = vmatprep.mubr.bf16.mxu0 %v472_v19  ;;  %v460_v24 = vmax.f32 %v409_v20, 0.0 }
 0x209   :  { %v1096_v21 = vpop.f32.mrf.mxu1  ;;  %1122 = vmatmul.mubr.bf16.vlgmr.msra.gmra.mxu0 %v473_v16 }
 0x20a   :  { %v463_v22 = vmax.f32 %v1096_v21, 0.0 }
 0x20b   :  { %v412_v23 = vpop.f32.mrf.mxu1 }
 0x20c   :  { %v461_v25 = vmax.f32 %v412_v23, 0.0  ;;  %v475_v29 = vpack.c.bf16 %v463_v22, %v462_v26 }
 0x20d   :  { %v1099_v27 = vpop.f32.mrf.mxu1 }
 0x20e   :  { %v474_v28 = vpack.c.bf16 %v461_v25, %v460_v24  ;;  %v466_v36 = vmax.f32 %v1099_v27, 0.0 }
 0x20f   :  { %v425_v30 = vpop.f32.mrf.mxu1 }
 0x210   :  { %1125 = vmatprep.mubr.bf16.mxu0 %v474_v28  ;;  %v464_v34 = vmax.f32 %v425_v30, 0.0 }
 0x211   :  { %v1100_v31 = vpop.f32.mrf.mxu1  ;;  %1126 = vmatmul.mubr.bf16.gmra.mxu0 %v475_v29 }
 0x212   :  { %v467_v32 = vmax.f32 %v1100_v31, 0.0 }
 0x213   :  { %v428_v33 = vpop.f32.mrf.mxu1 }
 0x214   :  { %v465_v35 = vmax.f32 %v428_v33, 0.0  ;;  %v477_v39 = vpack.c.bf16 %v467_v32, %v466_v36  ;;  %v976_v33 = vld [vmem:[%s1590_s6] ss:$0 sm:$0xff] }
 0x215   :  { %v1103_v37 = vpop.f32.mrf.mxu1 }
 0x216   :  { %v476_v38 = vpack.c.bf16 %v465_v35, %v464_v34  ;;  %v470_v46 = vmax.f32 %v1103_v37, 0.0 }
 0x217   :  { %v441_v40 = vpop.f32.mrf.mxu1 }
 0x218   :  { %1129 = vmatprep.mubr.bf16.mxu0 %v476_v38  ;;  %v468_v44 = vmax.f32 %v441_v40, 0.0 }
 0x219   :  { %v1104_v41 = vpop.f32.mrf.mxu1  ;;  %1130 = vmatmul.mubr.bf16.gmra.mxu0 %v477_v39 }
 0x21a   :  { %v471_v42 = vmax.f32 %v1104_v41, 0.0 }
 0x21b   :  { %v444_v43 = vpop.f32.mrf.mxu1 }
 0x21c   :  { %v469_v45 = vmax.f32 %v444_v43, 0.0  ;;  %v479_v48 = vpack.c.bf16 %v471_v42, %v470_v46 }
 0x21e   :  { %v478_v47 = vpack.c.bf16 %v469_v45, %v468_v44 }
 0x220   :  { %1133 = vmatprep.mubr.bf16.mxu0 %v478_v47 }
 0x221   :  { %1134 = vmatmul.mubr.bf16.gmra.mxu0 %v479_v48 }
 0x2c9   :  { %v1123_v49 = vpop.f32.mrf.mxu0 }
 0x2ca   :  { %v594_v28 = vadd.f32 %v1123_v49, %v967_v6 }
 0x2cb   :  { %v585_v50 = vpop.f32.mrf.mxu0 }
 0x2cc   :  { %v586_v31 = vadd.f32 %v967_v6, %v585_v50 }
 0x2cd   :  { %v1124_v51 = vpop.f32.mrf.mxu0 }
 0x2ce   :  { %v597_v26 = vadd.f32 %v1124_v51, %v967_v6 }
 0x2cf   :  { %v588_v52 = vpop.f32.mrf.mxu0 }
 0x2d0   :  { %v649_v29 = vpack.c.bf16 %v597_v26, %v594_v28  ;;  %v589_v30 = vadd.f32 %v967_v6, %v588_v52 }
 0x2d1   :  { %v1127_v53 = vpop.f32.mrf.mxu0 }
 0x2d2   :  { %v610_v22 = vadd.f32 %v1127_v53, %v967_v6  ;;  %v648_v32 = vpack.c.bf16 %v589_v30, %v586_v31 }
 0x2d3   :  { %v601_v54 = vpop.f32.mrf.mxu0 }
 0x2d4   :  { %v602_v25 = vadd.f32 %v967_v6, %v601_v54 }
 0x2d5   :  { %v1128_v55 = vpop.f32.mrf.mxu0 }
 0x2d6   :  { %v613_v20 = vadd.f32 %v1128_v55, %v967_v6 }
 0x2d7   :  { %v604_v56 = vpop.f32.mrf.mxu0 }
 0x2d8   :  { %v651_v23 = vpack.c.bf16 %v613_v20, %v610_v22  ;;  %v605_v24 = vadd.f32 %v967_v6, %v604_v56 }
 0x2d9   :  { %v1131_v57 = vpop.f32.mrf.mxu0 }
 0x2da   :  { %v626_v17 = vadd.f32 %v1131_v57, %v967_v6  ;;  %v650_v27 = vpack.c.bf16 %v605_v24, %v602_v25 }
 0x2db   :  { %v617_v58 = vpop.f32.mrf.mxu0 }
 0x2dc   :  { %v618_v16 = vadd.f32 %v967_v6, %v617_v58 }
 0x2dd   :  { %v1132_v59 = vpop.f32.mrf.mxu0 }
 0x2de   :  { %v629_v14 = vadd.f32 %v1132_v59, %v967_v6 }
 0x2df   :  { %v620_v60 = vpop.f32.mrf.mxu0 }
 0x2e0   :  { %v653_v18 = vpack.c.bf16 %v629_v14, %v626_v17  ;;  %v621_v19 = vadd.f32 %v967_v6, %v620_v60 }
 0x2e1   :  { %v1135_v61 = vpop.f32.mrf.mxu0 }
 0x2e2   :  { %v642_v8 = vadd.f32 %v1135_v61, %v967_v6  ;;  %v652_v21 = vpack.c.bf16 %v621_v19, %v618_v16 }
 0x2e3   :  { %v633_v62 = vpop.f32.mrf.mxu0 }
 0x2e4   :  { %v634_v11 = vadd.f32 %v967_v6, %v633_v62 }
 0x2e5   :  { %v1136_v7 = vpop.f32.mrf.mxu0 }
 0x2e6   :  { %v645_v9 = vadd.f32 %v1136_v7, %v967_v6 }
 0x2e7   :  { %v636_v10 = vpop.f32.mrf.mxu0 }
 0x2e8   :  { %v655_v12 = vpack.c.bf16 %v645_v9, %v642_v8  ;;  %v637_v13 = vadd.f32 %v967_v6, %v636_v10 }
 0x2ea   :  { %v654_v15 = vpack.c.bf16 %v637_v13, %v634_v11  ;;  %1137 = vmatprep.subr.bf16.mxu1 %v655_v12 }
 0x2eb   :  { %1138 = vmatpush3.bf16.msra.mxu1 %v655_v12 }
 0x2ec   :  { %1139 = vmatprep.subr.bf16.mxu1 %v654_v15 }
 0x2ef   :  { %1140 = vmatpush3.bf16.msra.mxu1 %v654_v15 }
 0x2f0   :  { %1141 = vmatprep.subr.bf16.mxu1 %v653_v18 }
 0x2f3   :  { %1142 = vmatpush3.bf16.msra.mxu1 %v653_v18 }
 0x2f4   :  { %1143 = vmatprep.subr.bf16.mxu1 %v652_v21 }
 0x2f7   :  { %1144 = vmatpush3.bf16.msra.mxu1 %v652_v21 }
 0x2f8   :  { %1145 = vmatprep.subr.bf16.mxu1 %v651_v23 }
 0x2fb   :  { %1146 = vmatpush3.bf16.msra.mxu1 %v651_v23 }
 0x2fc   :  { %1147 = vmatprep.subr.bf16.mxu1 %v650_v27 }
 0x2ff   :  { %1148 = vmatpush3.bf16.msra.mxu1 %v650_v27 }
 0x300   :  { %1149 = vmatprep.subr.bf16.mxu1 %v649_v29 }
 0x303   :  { %1150 = vmatpush3.bf16.msra.mxu1 %v649_v29 }
 0x304   :  { %1151 = vmatprep.subr.bf16.mxu1 %v648_v32 }
 0x307   :  { %1152 = vmatpush3.bf16.msra.mxu1 %v648_v32 }
 0x30a   :  { %1154 = vmatmul.mubr.bf16.vlgmr.msra.gmra.mxu1 %v1399_v63 }
 0x30b   :  { %1157 = vmatprep.mubr.bf16.mxu1 %v1404_v0 }
 0x312   :  { %1158 = vmatmul.mubr.bf16.gmra.mxu1 %v1411_v1 }
 0x313   :  { %1161 = vmatprep.mubr.bf16.mxu1 %v1416_v2 }
 0x31a   :  { %1162 = vmatmul.mubr.bf16.gmra.mxu1 %v1423_v3 }
 0x31b   :  { %1165 = vmatprep.mubr.bf16.mxu1 %v1428_v4 }
 0x322   :  { %1166 = vmatmul.mubr.bf16.gmra.mxu1 %v1435_v5 }
 0x3ca   :  { %v1155_v34 = vpop.f32.mrf.mxu1 }
 0x3cb   :  { %v706_v35 = vadd.f32 %v1155_v34, %v976_v33 }
 0x3cc   :  { %v697_v36 = vpop.f32.mrf.mxu1 }
 0x3cd   :  { %v698_v63 = vadd.f32 %v976_v33, %v697_v36  ;;  %764 = vmax.xlane.f32.xlu1 %v706_v35 }
 0x3ce   :  { %v1156_v0 = vpop.f32.mrf.mxu1 }
 0x3cf   :  { %v709_v37 = vadd.f32 %v1156_v0, %v976_v33  ;;  %760 = vmax.xlane.f32.xlu0 %v698_v63 }
 0x3d0   :  { %v700_v1 = vpop.f32.mrf.mxu1 }
 0x3d1   :  { %v701_v2 = vadd.f32 %v976_v33, %v700_v1  ;;  %766 = vmax.xlane.f32.xlu1 %v709_v37 }
 0x3d2   :  { %v1159_v3 = vpop.f32.mrf.mxu1 }
 0x3d3   :  { %762 = vmax.xlane.f32.xlu0 %v701_v2  ;;  %v722_v38 = vadd.f32 %v1159_v3, %v976_v33 }
 0x3d4   :  { %v713_v4 = vpop.f32.mrf.mxu1 }
 0x3d5   :  { %v714_v41 = vadd.f32 %v976_v33, %v713_v4 }
 0x3d6   :  { %v1160_v5 = vpop.f32.mrf.mxu1 }
 0x3d7   :  { %v725_v39 = vadd.f32 %v1160_v5, %v976_v33  ;;  %772 = vmax.xlane.f32.xlu0 %v722_v38 }
 0x3d8   :  { %v716_v40 = vpop.f32.mrf.mxu1 }
 0x3d9   :  { %774 = vmax.xlane.f32.xlu1 %v725_v39  ;;  %v717_v43 = vadd.f32 %v976_v33, %v716_v40 }
 0x3da   :  { %v1163_v42 = vpop.f32.mrf.mxu1 }
 0x3db   :  { %768 = vmax.xlane.f32.xlu0 %v714_v41  ;;  %v738_v45 = vadd.f32 %v1163_v42, %v976_v33 }
 0x3dc   :  { %v729_v44 = vpop.f32.mrf.mxu1 }
 0x3dd   :  { %770 = vmax.xlane.f32.xlu1 %v717_v43  ;;  %v730_v49 = vadd.f32 %v976_v33, %v729_v44 }
 0x3de   :  { %v1164_v46 = vpop.f32.mrf.mxu1 }
 0x3df   :  { %v741_v47 = vadd.f32 %v1164_v46, %v976_v33  ;;  %780 = vmax.xlane.f32.xlu0 %v738_v45 }
 0x3e0   :  { %v732_v48 = vpop.f32.mrf.mxu1 }
 0x3e1   :  { %782 = vmax.xlane.f32.xlu1 %v741_v47  ;;  %v1452_v51 = vadd.f32 %v976_v33, %v732_v48 }
 0x3e2   :  { %v1167_v50 = vpop.f32.mrf.mxu1 }
 0x3e3   :  { %776 = vmax.xlane.f32.xlu0 %v730_v49  ;;  %v1458_v56 = vadd.f32 %v1167_v50, %v976_v33 }
 0x3e4   :  { %v745_v52 = vpop.f32.mrf.mxu1 }
 0x3e5   :  { %v1454_v53 = vadd.f32 %v976_v33, %v745_v52  ;;  %778 = vmax.xlane.f32.xlu1 %v1452_v51 }
 0x3e6   :  { %v1168_v54 = vpop.f32.mrf.mxu1 }
 0x3e7   :  { %784 = vmax.xlane.f32.xlu0 %v1454_v53  ;;  %v1464_v58 = vadd.f32 %v1168_v54, %v976_v33 }
 0x3e8   :  { %v748_v55 = vpop.f32.mrf.mxu1 }
 0x3e9   :  { %v1460_v57 = vadd.f32 %v976_v33, %v748_v55 }
 0x3eb   :  { %786 = vmax.xlane.f32.xlu1 %v1460_v57  ;;  %788 = vmax.xlane.f32.xlu0 %v1458_v56 }
 0x3ef   :  { %790 = vmax.xlane.f32.xlu1 %v1464_v58 }
 0x456   :  { %v765_v59 = vpop.xlane.xlu1 %764 }
 0x457   :  { %v1467_v60 = vsub.f32 %v706_v35, %v765_v59 }
 0x458   :  { %v761_v61 = vpop.xlane.xlu0 %760 }
 0x459   :  { %v812_v62 = vmul.f32 1.442695, %v1467_v60  ;;  %v1470_v6 = vsub.f32 %v698_v63, %v761_v61 }
 0x45a   :  { %v767_v7 = vpop.xlane.xlu1 %766 }
 0x45b   :  { %1205 = vpow2.f32 %v812_v62  ;;  %v808_v8 = vmul.f32 1.442695, %v1470_v6  ;;  %v1473_v9 = vsub.f32 %v709_v37, %v767_v7 }
 0x45c   :  { %v763_v10 = vpop.xlane.xlu0 %762 }
 0x45d   :  { %v814_v11 = vmul.f32 1.442695, %v1473_v9  ;;  %v1476_v12 = vsub.f32 %v701_v2, %v763_v10  ;;  %1207 = vpow2.f32 %v808_v8 }
 0x45f   :  { %1209 = vpow2.f32 %v814_v11  ;;  %v810_v13 = vmul.f32 1.442695, %v1476_v12 }
 0x460   :  { %v773_v14 = vpop.xlane.xlu0 %772 }
 0x461   :  { %v1479_v15 = vsub.f32 %v722_v38, %v773_v14  ;;  %1211 = vpow2.f32 %v810_v13 }
 0x462   :  { %v775_v17 = vpop.xlane.xlu1 %774 }
 0x463   :  { %v820_v18 = vmul.f32 1.442695, %v1479_v15  ;;  %v1482_v19 = vsub.f32 %v725_v39, %v775_v17 }
 0x464   :  { %v769_v16 = vpop.xlane.xlu0 %768 }
 0x465   :  { %1213 = vpow2.f32 %v820_v18  ;;  %v822_v20 = vmul.f32 1.442695, %v1482_v19  ;;  %v1485_v21 = vsub.f32 %v714_v41, %v769_v16 }
 0x466   :  { %v771_v22 = vpop.xlane.xlu1 %770 }
 0x467   :  { %1215 = vpow2.f32 %v822_v20  ;;  %v816_v23 = vmul.f32 1.442695, %v1485_v21  ;;  %v1488_v24 = vsub.f32 %v717_v43, %v771_v22 }
 0x468   :  { %v1206_v25 = vpop.eup %1205  ;;  %v781_v26 = vpop.xlane.xlu0 %780 }
 0x469   :  { %1217 = vpow2.f32 %v816_v23  ;;  %v818_v27 = vmul.f32 1.442695, %v1488_v24  ;;  %v1491_v28 = vsub.f32 %v738_v45, %v781_v26  ;;  %844 = vadd.xlane.f32.xlu0 %v1206_v25 }
 0x46a   :  { %v783_v29 = vpop.xlane.xlu1 %782  ;;  %v1208_v30 = vpop.eup %1207 }
 0x46b   :  { %1219 = vpow2.f32 %v818_v27  ;;  %v828_v31 = vmul.f32 1.442695, %v1491_v28  ;;  %v1494_v32 = vsub.f32 %v741_v47, %v783_v29 }
 0x46c   :  { %v1210_v33 = vpop.eup %1209  ;;  %v777_v34 = vpop.xlane.xlu0 %776 }
 0x46d   :  { %1221 = vpow2.f32 %v828_v31  ;;  %v830_v35 = vmul.f32 1.442695, %v1494_v32  ;;  %v1497_v36 = vsub.f32 %v730_v49, %v777_v34  ;;  %846 = vadd.xlane.f32.xlu1 %v1210_v33  ;;  %840 = vadd.xlane.f32.xlu0 %v1208_v30 }
 0x46e   :  { %v779_v63 = vpop.xlane.xlu1 %778  ;;  %v1212_v1 = vpop.eup %1211 }
 0x46f   :  { %1223 = vpow2.f32 %v830_v35  ;;  %v824_v0 = vmul.f32 1.442695, %v1497_v36  ;;  %v1501_v37 = vsub.f32 %v1452_v51, %v779_v63 }
 0x470   :  { %v785_v2 = vpop.xlane.xlu0 %784 }
 0x471   :  { %1225 = vpow2.f32 %v824_v0  ;;  %v826_v3 = vmul.f32 1.442695, %v1501_v37  ;;  %v1505_v4 = vsub.f32 %v1454_v53, %v785_v2  ;;  %842 = vadd.xlane.f32.xlu1 %v1212_v1 }
 0x472   :  { %v1214_v38 = vpop.eup %1213 }
 0x473   :  { %1227 = vpow2.f32 %v826_v3  ;;  %v832_v5 = vmul.f32 1.442695, %v1505_v4  ;;  %852 = vadd.xlane.f32.xlu0 %v1214_v38 }
 0x474   :  { %v1216_v39 = vpop.eup %1215  ;;  %v787_v40 = vpop.xlane.xlu1 %786 }
 0x475   :  { %v789_v41 = vpop.xlane.xlu0 %788  ;;  %1229 = vpow2.f32 %v832_v5  ;;  %v1509_v42 = vsub.f32 %v1460_v57, %v787_v40  ;;  %854 = vadd.xlane.f32.xlu1 %v1216_v39 }
 0x476   :  { %v1512_v43 = vsub.f32 %v1458_v56, %v789_v41  ;;  %v1218_v44 = vpop.eup %1217 }
 0x477   :  { %v834_v45 = vmul.f32 1.442695, %v1509_v42  ;;  %848 = vadd.xlane.f32.xlu0 %v1218_v44 }
 0x478   :  { %v836_v46 = vmul.f32 1.442695, %v1512_v43  ;;  %v1220_v47 = vpop.eup %1219  ;;  %v791_v48 = vpop.xlane.xlu1 %790 }
 0x479   :  { %1231 = vpow2.f32 %v834_v45  ;;  %v1517_v49 = vsub.f32 %v1464_v58, %v791_v48  ;;  %850 = vadd.xlane.f32.xlu1 %v1220_v47 }
 0x47a   :  { %v1222_v50 = vpop.eup %1221  ;;  %1233 = vpow2.f32 %v836_v46 }
 0x47b   :  { %v838_v51 = vmul.f32 1.442695, %v1517_v49  ;;  %860 = vadd.xlane.f32.xlu0 %v1222_v50 }
 0x47c   :  { %v1224_v52 = vpop.eup %1223 }
 0x47d   :  { %1235 = vpow2.f32 %v838_v51  ;;  %862 = vadd.xlane.f32.xlu1 %v1224_v52 }
 0x47e   :  { %v1226_v53 = vpop.eup %1225 }
 0x47f   :  { %856 = vadd.xlane.f32.xlu0 %v1226_v53 }
 0x480   :  { %v1228_v54 = vpop.eup %1227 }
 0x481   :  { %858 = vadd.xlane.f32.xlu1 %v1228_v54 }
 0x482   :  { %v1230_v55 = vpop.eup %1229 }
 0x483   :  { %864 = vadd.xlane.f32.xlu0 %v1230_v55 }
 0x486   :  { %v1232_v56 = vpop.eup %1231 }
 0x487   :  { %v1234_v57 = vpop.eup %1233  ;;  %866 = vadd.xlane.f32.xlu1 %v1232_v56 }
 0x488   :  { %868 = vadd.xlane.f32.xlu0 %v1234_v57 }
 0x48a   :  { %v1236_v58 = vpop.eup %1235 }
 0x48b   :  { %870 = vadd.xlane.f32.xlu1 %v1236_v58 }
 0x4f2   :  { %v845_v59 = vpop.xlane.xlu0 %844 }
 0x4f3   :  { %1237 = vlog2.f32 %v845_v59 }
 0x4f6   :  { %v847_v61 = vpop.xlane.xlu1 %846  ;;  %v841_v62 = vpop.xlane.xlu0 %840 }
 0x4f7   :  { %1239 = vlog2.f32 %v847_v61 }
 0x4f8   :  { %1241 = vlog2.f32 %v841_v62 }
 0x4fa   :  { %v843_v7 = vpop.xlane.xlu1 %842 }
 0x4fb   :  { %1243 = vlog2.f32 %v843_v7 }
 0x4fc   :  { %v853_v8 = vpop.xlane.xlu0 %852 }
 0x4fd   :  { %1245 = vlog2.f32 %v853_v8 }
 0x4fe   :  { %v855_v10 = vpop.xlane.xlu1 %854 }
 0x4ff   :  { %1247 = vlog2.f32 %v855_v10 }
 0x500   :  { %v1238_v11 = vpop.eup %1237  ;;  %v849_v13 = vpop.xlane.xlu0 %848 }
 0x501   :  { %v877_v14 = vmul.f32 0.6931472, %v1238_v11  ;;  %1249 = vlog2.f32 %v849_v13 }
 0x502   :  { %v851_v17 = vpop.xlane.xlu1 %850 }
 0x503   :  { %v906_v18 = vsub.f32 %v1467_v60, %v877_v14  ;;  %1251 = vlog2.f32 %v851_v17 }
 0x504   :  { %v1240_v16 = vpop.eup %1239  ;;  %v861_v20 = vpop.xlane.xlu0 %860 }
 0x505   :  { %v1242_v22 = vpop.eup %1241  ;;  %922 = vst [vmem:[%s1591_s7 + $0x10] sm:$0xff] %v906_v18  ;;  %v879_v23 = vmul.f32 0.6931472, %v1240_v16  ;;  %1253 = vlog2.f32 %v861_v20 }
 0x506   :  { %v873_v25 = vmul.f32 0.6931472, %v1242_v22  ;;  %v863_v26 = vpop.xlane.xlu1 %862 }
 0x507   :  { %v907_v27 = vsub.f32 %v1473_v9, %v879_v23  ;;  %1255 = vlog2.f32 %v863_v26 }
 0x508   :  { %v1244_v29 = vpop.eup %1243  ;;  %v904_v30 = vsub.f32 %v1470_v6, %v873_v25  ;;  %v857_v31 = vpop.xlane.xlu0 %856 }
 0x509   :  { %923 = vst [vmem:[%s1591_s7 + $0x18] sm:$0xff] %v907_v27  ;;  %v875_v60 = vmul.f32 0.6931472, %v1244_v29  ;;  %1257 = vlog2.f32 %v857_v31 }
 0x50a   :  { %v1246_v33 = vpop.eup %1245  ;;  %920 = vst [vmem:[%s1591_s7] sm:$0xff] %v904_v30  ;;  %v859_v34 = vpop.xlane.xlu1 %858 }
 0x50b   :  { %v905_v35 = vsub.f32 %v1476_v12, %v875_v60  ;;  %v885_v9 = vmul.f32 0.6931472, %v1246_v33  ;;  %1259 = vlog2.f32 %v859_v34 }
 0x50c   :  { %v1248_v63 = vpop.eup %1247  ;;  %v865_v0 = vpop.xlane.xlu0 %864 }
 0x50d   :  { %921 = vst [vmem:[%s1591_s7 + $0x8] sm:$0xff] %v905_v35  ;;  %v910_v6 = vsub.f32 %v1479_v15, %v885_v9  ;;  %v887_v1 = vmul.f32 0.6931472, %v1248_v63  ;;  %1261 = vlog2.f32 %v865_v0 }
 0x50e   :  { %v1250_v2 = vpop.eup %1249 }
 0x50f   :  { %926 = vst [vmem:[%s1591_s7 + $0x30] sm:$0xff] %v910_v6  ;;  %v911_v3 = vsub.f32 %v1482_v19, %v887_v1  ;;  %v881_v12 = vmul.f32 0.6931472, %v1250_v2 }
 0x510   :  { %v1252_v38 = vpop.eup %1251  ;;  %v867_v5 = vpop.xlane.xlu1 %866 }
 0x511   :  { %927 = vst [vmem:[%s1591_s7 + $0x38] sm:$0xff] %v911_v3  ;;  %v908_v39 = vsub.f32 %v1485_v21, %v881_v12  ;;  %v883_v40 = vmul.f32 0.6931472, %v1252_v38  ;;  %1263 = vlog2.f32 %v867_v5  ;;  %v869_v15 = vpop.xlane.xlu0 %868 }
 0x512   :  { %v1254_v41 = vpop.eup %1253  ;;  %1265 = vlog2.f32 %v869_v15 }
 0x513   :  { %924 = vst [vmem:[%s1591_s7 + $0x20] sm:$0xff] %v908_v39  ;;  %v909_v19 = vsub.f32 %v1488_v24, %v883_v40  ;;  %v893_v44 = vmul.f32 0.6931472, %v1254_v41 }
 0x514   :  { %v1256_v45 = vpop.eup %1255  ;;  %v871_v46 = vpop.xlane.xlu1 %870 }
 0x515   :  { %925 = vst [vmem:[%s1591_s7 + $0x28] sm:$0xff] %v909_v19  ;;  %v914_v21 = vsub.f32 %v1491_v28, %v893_v44  ;;  %v895_v47 = vmul.f32 0.6931472, %v1256_v45  ;;  %1267 = vlog2.f32 %v871_v46 }
 0x516   :  { %v1258_v48 = vpop.eup %1257 }
 0x517   :  { %930 = vst [vmem:[%s1591_s7 + $0x50] sm:$0xff] %v914_v21  ;;  %v915_v50 = vsub.f32 %v1494_v32, %v895_v47  ;;  %v889_v51 = vmul.f32 0.6931472, %v1258_v48 }
 0x518   :  { %v1260_v24 = vpop.eup %1259 }
 0x519   :  { %931 = vst [vmem:[%s1591_s7 + $0x58] sm:$0xff] %v915_v50  ;;  %v912_v52 = vsub.f32 %v1497_v36, %v889_v51  ;;  %v891_v53 = vmul.f32 0.6931472, %v1260_v24 }
 0x51a   :  { %v1262_v54 = vpop.eup %1261 }
 0x51b   :  { %928 = vst [vmem:[%s1591_s7 + $0x40] sm:$0xff] %v912_v52  ;;  %v913_v28 = vsub.f32 %v1501_v37, %v891_v53  ;;  %v897_v55 = vmul.f32 0.6931472, %v1262_v54 }
 0x51d   :  { %929 = vst [vmem:[%s1591_s7 + $0x48] sm:$0xff] %v913_v28  ;;  %v916_v32 = vsub.f32 %v1505_v4, %v897_v55 }
 0x51e   :  { %v1264_v56 = vpop.eup %1263 }
 0x51f   :  { %v1266_v57 = vpop.eup %1265  ;;  %932 = vst [vmem:[%s1591_s7 + $0x60] sm:$0xff] %v916_v32  ;;  %v899_v36 = vmul.f32 0.6931472, %v1264_v56 }
 0x520   :  { %v901_v58 = vmul.f32 0.6931472, %v1266_v57 }
 0x521   :  { %v917_v59 = vsub.f32 %v1509_v42, %v899_v36 }
 0x522   :  { %v1268_v61 = vpop.eup %1267  ;;  %v918_v37 = vsub.f32 %v1512_v43, %v901_v58 }
 0x523   :  { %933 = vst [vmem:[%s1591_s7 + $0x68] sm:$0xff] %v917_v59  ;;  %v903_v62 = vmul.f32 0.6931472, %v1268_v61 }
 0x524   :  { %934 = vst [vmem:[%s1591_s7 + $0x70] sm:$0xff] %v918_v37 }
 0x525   :  { %v919_v4 = vsub.f32 %v1517_v49, %v903_v62 }
 0x527   :  { %935 = vst [vmem:[%s1591_s7 + $0x78] sm:$0xff] %v919_v4 }
 0x528   :  { %940 = vsyncpa [#allocation3], 1 }
 0x529   :  { %941 = vsyncpa [#allocation5], 1 }

</bundles_post_ra>
